<compile_context>
chip_gen: v7x
topology: tpu7x:2x2x1
jax: 0.10.0
libtpu: 0.0.40
codegen_flags: <defaults>
</compile_context>

<pallas_src>
import math

import jax
import jax.numpy as jnp
from jax.experimental import pallas as pl
from jax.experimental.pallas import tpu as pltpu


def make_positional_encoding_table(d_model, max_len=1000, dtype=jnp.float32):
    """Same `pe` buffer as the PyTorch module's __init__."""
    d_half = d_model // 2
    position = jnp.arange(max_len, dtype=jnp.float32)[:, None]              # (max_len, 1)
    div_term = jnp.exp(
        jnp.arange(d_half, dtype=jnp.float32) * (-math.log(10000.0) / d_half)
    )                                                                        # (d_half,)
    angles = position * div_term                                             # (max_len, d_half)
    pe = jnp.concatenate([jnp.sin(angles), jnp.cos(angles)], axis=1)         # (max_len, 2*d_half)
    return pe.astype(dtype)


def _pe_gather_kernel(t_sref, pe_ref, o_ref):
    """o[j, :] = pe[t[block*tb + j], :] for j in [0, tb)."""
    i = pl.program_id(0)
    tb = o_ref.shape[0]
    max_row = pe_ref.shape[0] - 1
    for j in range(tb):  # small static unroll; only the *read* row is dynamic
        idx = t_sref[i * tb + j]                              # scalar read from SMEM
        idx = jnp.minimum(jnp.maximum(idx, 0), max_row)       # guard VMEM OOB (no HW check)
        o_ref[j:j + 1, :] = pe_ref[pl.ds(idx, 1), :]          # dynamic-row read, static-row write


def _round_up(x, m):
    return ((x + m - 1) // m) * m


def positional_encoding_lookup(pe, t, *, block_t=32):
    """Pallas equivalent of `self.pe[t]` for an integer index array t of any shape."""
    L, D = pe.shape
    t_shape = t.shape
    t_flat = jnp.ravel(t).astype(jnp.int32)
    n = int(t_flat.shape[0])
    if n == 0:
        return jnp.zeros(t_shape + (D,), pe.dtype)

    # Minimal padding: indices padded (with 0, a valid row) only up to the
    # block granularity; block is a multiple of 8 and never larger than needed.
    tb = min(max(8, _round_up(block_t, 8)), _round_up(n, 8))
    n_pad = _round_up(n, tb)
    t_pad = jnp.pad(t_flat, (0, n_pad - n))

    itemsize = jnp.dtype(pe.dtype).itemsize
    cost = pl.CostEstimate(
        flops=0,
        transcendentals=0,
        bytes_accessed=int(pe.size * itemsize + n_pad * 4 + n_pad * D * itemsize),
    )

    out = pl.pallas_call(
        _pe_gather_kernel,
        out_shape=jax.ShapeDtypeStruct((n_pad, D), pe.dtype),
        grid_spec=pltpu.PrefetchScalarGridSpec(
            num_scalar_prefetch=1,                     # t_pad -> SMEM
            grid=(n_pad // tb,),
            in_specs=[
                # whole pe table resident in VMEM (constant block index)
                pl.BlockSpec((L, D), lambda i, t_s: (0, 0)),
            ],
            out_specs=pl.BlockSpec((tb, D), lambda i, t_s: (i, 0)),
        ),
        compiler_params=pltpu.CompilerParams(
            dimension_semantics=("parallel",),         # grid steps independent (v7x: 2 TCs)
        ),
        cost_estimate=cost,
    )(t_pad, pe)

    # TODO(synk): for tables too large for VMEM, switch to an index_map-driven
    # DMA gather instead of keeping pe fully resident.
    return out[:n].reshape(t_shape + (D,))


if __name__ == "__main__":
    d_model = 32
    max_len = 1000
    pe = make_positional_encoding_table(d_model, max_len)   # (1000, 32) f32

    key = jax.random.PRNGKey(0)
    t = jax.random.randint(key, (2, 8), 0, max_len, dtype=jnp.int32)  # batch=2, seq=8

    y = positional_encoding_lookup(pe, t)
    jax.block_until_ready(y)

    y_ref = pe[t]  # pure-JAX reference gather
    assert y.shape == t.shape + (pe.shape[1],), (y.shape, t.shape)
    assert y.dtype == pe.dtype
    assert jnp.array_equal(y, y_ref), "kernel gather does not match reference"

    print("KERNEL_OK")
</pallas_src>

<mosaic_0001>
module attributes {stable_mosaic.version = 11 : i64} {
  func.func @_pe_gather_kernel(%arg0: i32, %arg1: memref<16xi32, #tpu.memory_space<smem>>, %arg2: memref<1000x32xf32, #tpu.memory_space<vmem>>, %arg3: memref<16x32xf32, #tpu.memory_space<vmem>>) attributes {dimension_semantics = [#tpu.dimension_semantics<parallel>], iteration_bounds = array<i64: 1>, scalar_prefetch = 1 : i64, scratch_operands = 0 : i64, tpu.core_type = #tpu.core_type<tc>, window_params = [{pipeline_mode = #tpu.pipeline_mode<synchronous>, transform_indices = @transform_0, window_bounds = array<i64: 1000, 32>}, {transform_indices = @transform_1, window_bounds = array<i64: 16, 32>}]} {
    %c16_i32 = arith.constant 16 : i32
    %0 = arith.muli %arg0, %c16_i32 : i32
    %c0_i32 = arith.constant 0 : i32
    %1 = arith.addi %0, %c0_i32 : i32
    %2 = arith.index_cast %1 : i32 to index
    %3 = memref.load %arg1[%2] : memref<16xi32, #tpu.memory_space<smem>>
    %c0_i32_0 = arith.constant 0 : i32
    %4 = arith.maxsi %3, %c0_i32_0 : i32
    %c999_i32 = arith.constant 999 : i32
    %5 = arith.minsi %4, %c999_i32 : i32
    %6 = arith.index_cast %5 : i32 to index
    %c0 = arith.constant 0 : index
    %7 = vector.load %arg2[%6, %c0] : memref<1000x32xf32, #tpu.memory_space<vmem>>, vector<1x32xf32>
    %c0_1 = arith.constant 0 : index
    %c0_2 = arith.constant 0 : index
    %8 = vector.load %arg3[%c0_1, %c0_2] : memref<16x32xf32, #tpu.memory_space<vmem>>, vector<1x32xf32>
    tpu.vector_store %arg3[%c0_1, %c0_2], %7 {strides = array<i32>} : memref<16x32xf32, #tpu.memory_space<vmem>>, vector<1x32xf32>,
    %c16_i32_3 = arith.constant 16 : i32
    %9 = arith.muli %arg0, %c16_i32_3 : i32
    %c1_i32 = arith.constant 1 : i32
    %10 = arith.addi %9, %c1_i32 : i32
    %11 = arith.index_cast %10 : i32 to index
    %12 = memref.load %arg1[%11] : memref<16xi32, #tpu.memory_space<smem>>
    %c0_i32_4 = arith.constant 0 : i32
    %13 = arith.maxsi %12, %c0_i32_4 : i32
    %c999_i32_5 = arith.constant 999 : i32
    %14 = arith.minsi %13, %c999_i32_5 : i32
    %15 = arith.index_cast %14 : i32 to index
    %c0_6 = arith.constant 0 : index
    %16 = vector.load %arg2[%15, %c0_6] : memref<1000x32xf32, #tpu.memory_space<vmem>>, vector<1x32xf32>
    %c1 = arith.constant 1 : index
    %c0_7 = arith.constant 0 : index
    %17 = vector.load %arg3[%c1, %c0_7] : memref<16x32xf32, #tpu.memory_space<vmem>>, vector<1x32xf32>
    tpu.vector_store %arg3[%c1, %c0_7], %16 {strides = array<i32>} : memref<16x32xf32, #tpu.memory_space<vmem>>, vector<1x32xf32>,
    %c16_i32_8 = arith.constant 16 : i32
    %18 = arith.muli %arg0, %c16_i32_8 : i32
    %c2_i32 = arith.constant 2 : i32
    %19 = arith.addi %18, %c2_i32 : i32
    %20 = arith.index_cast %19 : i32 to index
    %21 = memref.load %arg1[%20] : memref<16xi32, #tpu.memory_space<smem>>
    %c0_i32_9 = arith.constant 0 : i32
    %22 = arith.maxsi %21, %c0_i32_9 : i32
    %c999_i32_10 = arith.constant 999 : i32
    %23 = arith.minsi %22, %c999_i32_10 : i32
    %24 = arith.index_cast %23 : i32 to index
    %c0_11 = arith.constant 0 : index
    %25 = vector.load %arg2[%24, %c0_11] : memref<1000x32xf32, #tpu.memory_space<vmem>>, vector<1x32xf32>
    %c2 = arith.constant 2 : index
    %c0_12 = arith.constant 0 : index
    %26 = vector.load %arg3[%c2, %c0_12] : memref<16x32xf32, #tpu.memory_space<vmem>>, vector<1x32xf32>
    tpu.vector_store %arg3[%c2, %c0_12], %25 {strides = array<i32>} : memref<16x32xf32, #tpu.memory_space<vmem>>, vector<1x32xf32>,
    %c16_i32_13 = arith.constant 16 : i32
    %27 = arith.muli %arg0, %c16_i32_13 : i32
    %c3_i32 = arith.constant 3 : i32
    %28 = arith.addi %27, %c3_i32 : i32
    %29 = arith.index_cast %28 : i32 to index
    %30 = memref.load %arg1[%29] : memref<16xi32, #tpu.memory_space<smem>>
    %c0_i32_14 = arith.constant 0 : i32
    %31 = arith.maxsi %30, %c0_i32_14 : i32
    %c999_i32_15 = arith.constant 999 : i32
    %32 = arith.minsi %31, %c999_i32_15 : i32
    %33 = arith.index_cast %32 : i32 to index
    %c0_16 = arith.constant 0 : index
    %34 = vector.load %arg2[%33, %c0_16] : memref<1000x32xf32, #tpu.memory_space<vmem>>, vector<1x32xf32>
    %c3 = arith.constant 3 : index
    %c0_17 = arith.constant 0 : index
    %35 = vector.load %arg3[%c3, %c0_17] : memref<16x32xf32, #tpu.memory_space<vmem>>, vector<1x32xf32>
    tpu.vector_store %arg3[%c3, %c0_17], %34 {strides = array<i32>} : memref<16x32xf32, #tpu.memory_space<vmem>>, vector<1x32xf32>,
    %c16_i32_18 = arith.constant 16 : i32
    %36 = arith.muli %arg0, %c16_i32_18 : i32
    %c4_i32 = arith.constant 4 : i32
    %37 = arith.addi %36, %c4_i32 : i32
    %38 = arith.index_cast %37 : i32 to index
    %39 = memref.load %arg1[%38] : memref<16xi32, #tpu.memory_space<smem>>
    %c0_i32_19 = arith.constant 0 : i32
    %40 = arith.maxsi %39, %c0_i32_19 : i32
    %c999_i32_20 = arith.constant 999 : i32
    %41 = arith.minsi %40, %c999_i32_20 : i32
    %42 = arith.index_cast %41 : i32 to index
    %c0_21 = arith.constant 0 : index
    %43 = vector.load %arg2[%42, %c0_21] : memref<1000x32xf32, #tpu.memory_space<vmem>>, vector<1x32xf32>
    %c4 = arith.constant 4 : index
    %c0_22 = arith.constant 0 : index
    %44 = vector.load %arg3[%c4, %c0_22] : memref<16x32xf32, #tpu.memory_space<vmem>>, vector<1x32xf32>
    tpu.vector_store %arg3[%c4, %c0_22], %43 {strides = array<i32>} : memref<16x32xf32, #tpu.memory_space<vmem>>, vector<1x32xf32>,
    %c16_i32_23 = arith.constant 16 : i32
    %45 = arith.muli %arg0, %c16_i32_23 : i32
    %c5_i32 = arith.constant 5 : i32
    %46 = arith.addi %45, %c5_i32 : i32
    %47 = arith.index_cast %46 : i32 to index
    %48 = memref.load %arg1[%47] : memref<16xi32, #tpu.memory_space<smem>>
    %c0_i32_24 = arith.constant 0 : i32
    %49 = arith.maxsi %48, %c0_i32_24 : i32
    %c999_i32_25 = arith.constant 999 : i32
    %50 = arith.minsi %49, %c999_i32_25 : i32
    %51 = arith.index_cast %50 : i32 to index
    %c0_26 = arith.constant 0 : index
    %52 = vector.load %arg2[%51, %c0_26] : memref<1000x32xf32, #tpu.memory_space<vmem>>, vector<1x32xf32>
    %c5 = arith.constant 5 : index
    %c0_27 = arith.constant 0 : index
    %53 = vector.load %arg3[%c5, %c0_27] : memref<16x32xf32, #tpu.memory_space<vmem>>, vector<1x32xf32>
    tpu.vector_store %arg3[%c5, %c0_27], %52 {strides = array<i32>} : memref<16x32xf32, #tpu.memory_space<vmem>>, vector<1x32xf32>,
    %c16_i32_28 = arith.constant 16 : i32
    %54 = arith.muli %arg0, %c16_i32_28 : i32
    %c6_i32 = arith.constant 6 : i32
    %55 = arith.addi %54, %c6_i32 : i32
    %56 = arith.index_cast %55 : i32 to index
    %57 = memref.load %arg1[%56] : memref<16xi32, #tpu.memory_space<smem>>
    %c0_i32_29 = arith.constant 0 : i32
    %58 = arith.maxsi %57, %c0_i32_29 : i32
    %c999_i32_30 = arith.constant 999 : i32
    %59 = arith.minsi %58, %c999_i32_30 : i32
    %60 = arith.index_cast %59 : i32 to index
    %c0_31 = arith.constant 0 : index
    %61 = vector.load %arg2[%60, %c0_31] : memref<1000x32xf32, #tpu.memory_space<vmem>>, vector<1x32xf32>
    %c6 = arith.constant 6 : index
    %c0_32 = arith.constant 0 : index
    %62 = vector.load %arg3[%c6, %c0_32] : memref<16x32xf32, #tpu.memory_space<vmem>>, vector<1x32xf32>
    tpu.vector_store %arg3[%c6, %c0_32], %61 {strides = array<i32>} : memref<16x32xf32, #tpu.memory_space<vmem>>, vector<1x32xf32>,
    %c16_i32_33 = arith.constant 16 : i32
    %63 = arith.muli %arg0, %c16_i32_33 : i32
    %c7_i32 = arith.constant 7 : i32
    %64 = arith.addi %63, %c7_i32 : i32
    %65 = arith.index_cast %64 : i32 to index
    %66 = memref.load %arg1[%65] : memref<16xi32, #tpu.memory_space<smem>>
    %c0_i32_34 = arith.constant 0 : i32
    %67 = arith.maxsi %66, %c0_i32_34 : i32
    %c999_i32_35 = arith.constant 999 : i32
    %68 = arith.minsi %67, %c999_i32_35 : i32
    %69 = arith.index_cast %68 : i32 to index
    %c0_36 = arith.constant 0 : index
    %70 = vector.load %arg2[%69, %c0_36] : memref<1000x32xf32, #tpu.memory_space<vmem>>, vector<1x32xf32>
    %c7 = arith.constant 7 : index
    %c0_37 = arith.constant 0 : index
    %71 = vector.load %arg3[%c7, %c0_37] : memref<16x32xf32, #tpu.memory_space<vmem>>, vector<1x32xf32>
    tpu.vector_store %arg3[%c7, %c0_37], %70 {strides = array<i32>} : memref<16x32xf32, #tpu.memory_space<vmem>>, vector<1x32xf32>,
    %c16_i32_38 = arith.constant 16 : i32
    %72 = arith.muli %arg0, %c16_i32_38 : i32
    %c8_i32 = arith.constant 8 : i32
    %73 = arith.addi %72, %c8_i32 : i32
    %74 = arith.index_cast %73 : i32 to index
    %75 = memref.load %arg1[%74] : memref<16xi32, #tpu.memory_space<smem>>
    %c0_i32_39 = arith.constant 0 : i32
    %76 = arith.maxsi %75, %c0_i32_39 : i32
    %c999_i32_40 = arith.constant 999 : i32
    %77 = arith.minsi %76, %c999_i32_40 : i32
    %78 = arith.index_cast %77 : i32 to index
    %c0_41 = arith.constant 0 : index
    %79 = vector.load %arg2[%78, %c0_41] : memref<1000x32xf32, #tpu.memory_space<vmem>>, vector<1x32xf32>
    %c8 = arith.constant 8 : index
    %c0_42 = arith.constant 0 : index
    %80 = vector.load %arg3[%c8, %c0_42] : memref<16x32xf32, #tpu.memory_space<vmem>>, vector<1x32xf32>
    tpu.vector_store %arg3[%c8, %c0_42], %79 {strides = array<i32>} : memref<16x32xf32, #tpu.memory_space<vmem>>, vector<1x32xf32>,
    %c16_i32_43 = arith.constant 16 : i32
    %81 = arith.muli %arg0, %c16_i32_43 : i32
    %c9_i32 = arith.constant 9 : i32
    %82 = arith.addi %81, %c9_i32 : i32
    %83 = arith.index_cast %82 : i32 to index
    %84 = memref.load %arg1[%83] : memref<16xi32, #tpu.memory_space<smem>>
    %c0_i32_44 = arith.constant 0 : i32
    %85 = arith.maxsi %84, %c0_i32_44 : i32
    %c999_i32_45 = arith.constant 999 : i32
    %86 = arith.minsi %85, %c999_i32_45 : i32
    %87 = arith.index_cast %86 : i32 to index
    %c0_46 = arith.constant 0 : index
    %88 = vector.load %arg2[%87, %c0_46] : memref<1000x32xf32, #tpu.memory_space<vmem>>, vector<1x32xf32>
    %c9 = arith.constant 9 : index
    %c0_47 = arith.constant 0 : index
    %89 = vector.load %arg3[%c9, %c0_47] : memref<16x32xf32, #tpu.memory_space<vmem>>, vector<1x32xf32>
    tpu.vector_store %arg3[%c9, %c0_47], %88 {strides = array<i32>} : memref<16x32xf32, #tpu.memory_space<vmem>>, vector<1x32xf32>,
    %c16_i32_48 = arith.constant 16 : i32
    %90 = arith.muli %arg0, %c16_i32_48 : i32
    %c10_i32 = arith.constant 10 : i32
    %91 = arith.addi %90, %c10_i32 : i32
    %92 = arith.index_cast %91 : i32 to index
    %93 = memref.load %arg1[%92] : memref<16xi32, #tpu.memory_space<smem>>
    %c0_i32_49 = arith.constant 0 : i32
    %94 = arith.maxsi %93, %c0_i32_49 : i32
    %c999_i32_50 = arith.constant 999 : i32
    %95 = arith.minsi %94, %c999_i32_50 : i32
    %96 = arith.index_cast %95 : i32 to index
    %c0_51 = arith.constant 0 : index
    %97 = vector.load %arg2[%96, %c0_51] : memref<1000x32xf32, #tpu.memory_space<vmem>>, vector<1x32xf32>
    %c10 = arith.constant 10 : index
    %c0_52 = arith.constant 0 : index
    %98 = vector.load %arg3[%c10, %c0_52] : memref<16x32xf32, #tpu.memory_space<vmem>>, vector<1x32xf32>
    tpu.vector_store %arg3[%c10, %c0_52], %97 {strides = array<i32>} : memref<16x32xf32, #tpu.memory_space<vmem>>, vector<1x32xf32>,
    %c16_i32_53 = arith.constant 16 : i32
    %99 = arith.muli %arg0, %c16_i32_53 : i32
    %c11_i32 = arith.constant 11 : i32
    %100 = arith.addi %99, %c11_i32 : i32
    %101 = arith.index_cast %100 : i32 to index
    %102 = memref.load %arg1[%101] : memref<16xi32, #tpu.memory_space<smem>>
    %c0_i32_54 = arith.constant 0 : i32
    %103 = arith.maxsi %102, %c0_i32_54 : i32
    %c999_i32_55 = arith.constant 999 : i32
    %104 = arith.minsi %103, %c999_i32_55 : i32
    %105 = arith.index_cast %104 : i32 to index
    %c0_56 = arith.constant 0 : index
    %106 = vector.load %arg2[%105, %c0_56] : memref<1000x32xf32, #tpu.memory_space<vmem>>, vector<1x32xf32>
    %c11 = arith.constant 11 : index
    %c0_57 = arith.constant 0 : index
    %107 = vector.load %arg3[%c11, %c0_57] : memref<16x32xf32, #tpu.memory_space<vmem>>, vector<1x32xf32>
    tpu.vector_store %arg3[%c11, %c0_57], %106 {strides = array<i32>} : memref<16x32xf32, #tpu.memory_space<vmem>>, vector<1x32xf32>,
    %c16_i32_58 = arith.constant 16 : i32
    %108 = arith.muli %arg0, %c16_i32_58 : i32
    %c12_i32 = arith.constant 12 : i32
    %109 = arith.addi %108, %c12_i32 : i32
    %110 = arith.index_cast %109 : i32 to index
    %111 = memref.load %arg1[%110] : memref<16xi32, #tpu.memory_space<smem>>
    %c0_i32_59 = arith.constant 0 : i32
    %112 = arith.maxsi %111, %c0_i32_59 : i32
    %c999_i32_60 = arith.constant 999 : i32
    %113 = arith.minsi %112, %c999_i32_60 : i32
    %114 = arith.index_cast %113 : i32 to index
    %c0_61 = arith.constant 0 : index
    %115 = vector.load %arg2[%114, %c0_61] : memref<1000x32xf32, #tpu.memory_space<vmem>>, vector<1x32xf32>
    %c12 = arith.constant 12 : index
    %c0_62 = arith.constant 0 : index
    %116 = vector.load %arg3[%c12, %c0_62] : memref<16x32xf32, #tpu.memory_space<vmem>>, vector<1x32xf32>
    tpu.vector_store %arg3[%c12, %c0_62], %115 {strides = array<i32>} : memref<16x32xf32, #tpu.memory_space<vmem>>, vector<1x32xf32>,
    %c16_i32_63 = arith.constant 16 : i32
    %117 = arith.muli %arg0, %c16_i32_63 : i32
    %c13_i32 = arith.constant 13 : i32
    %118 = arith.addi %117, %c13_i32 : i32
    %119 = arith.index_cast %118 : i32 to index
    %120 = memref.load %arg1[%119] : memref<16xi32, #tpu.memory_space<smem>>
    %c0_i32_64 = arith.constant 0 : i32
    %121 = arith.maxsi %120, %c0_i32_64 : i32
    %c999_i32_65 = arith.constant 999 : i32
    %122 = arith.minsi %121, %c999_i32_65 : i32
    %123 = arith.index_cast %122 : i32 to index
    %c0_66 = arith.constant 0 : index
    %124 = vector.load %arg2[%123, %c0_66] : memref<1000x32xf32, #tpu.memory_space<vmem>>, vector<1x32xf32>
    %c13 = arith.constant 13 : index
    %c0_67 = arith.constant 0 : index
    %125 = vector.load %arg3[%c13, %c0_67] : memref<16x32xf32, #tpu.memory_space<vmem>>, vector<1x32xf32>
    tpu.vector_store %arg3[%c13, %c0_67], %124 {strides = array<i32>} : memref<16x32xf32, #tpu.memory_space<vmem>>, vector<1x32xf32>,
    %c16_i32_68 = arith.constant 16 : i32
    %126 = arith.muli %arg0, %c16_i32_68 : i32
    %c14_i32 = arith.constant 14 : i32
    %127 = arith.addi %126, %c14_i32 : i32
    %128 = arith.index_cast %127 : i32 to index
    %129 = memref.load %arg1[%128] : memref<16xi32, #tpu.memory_space<smem>>
    %c0_i32_69 = arith.constant 0 : i32
    %130 = arith.maxsi %129, %c0_i32_69 : i32
    %c999_i32_70 = arith.constant 999 : i32
    %131 = arith.minsi %130, %c999_i32_70 : i32
    %132 = arith.index_cast %131 : i32 to index
    %c0_71 = arith.constant 0 : index
    %133 = vector.load %arg2[%132, %c0_71] : memref<1000x32xf32, #tpu.memory_space<vmem>>, vector<1x32xf32>
    %c14 = arith.constant 14 : index
    %c0_72 = arith.constant 0 : index
    %134 = vector.load %arg3[%c14, %c0_72] : memref<16x32xf32, #tpu.memory_space<vmem>>, vector<1x32xf32>
    tpu.vector_store %arg3[%c14, %c0_72], %133 {strides = array<i32>} : memref<16x32xf32, #tpu.memory_space<vmem>>, vector<1x32xf32>,
    %c16_i32_73 = arith.constant 16 : i32
    %135 = arith.muli %arg0, %c16_i32_73 : i32
    %c15_i32 = arith.constant 15 : i32
    %136 = arith.addi %135, %c15_i32 : i32
    %137 = arith.index_cast %136 : i32 to index
    %138 = memref.load %arg1[%137] : memref<16xi32, #tpu.memory_space<smem>>
    %c0_i32_74 = arith.constant 0 : i32
    %139 = arith.maxsi %138, %c0_i32_74 : i32
    %c999_i32_75 = arith.constant 999 : i32
    %140 = arith.minsi %139, %c999_i32_75 : i32
    %141 = arith.index_cast %140 : i32 to index
    %c0_76 = arith.constant 0 : index
    %142 = vector.load %arg2[%141, %c0_76] : memref<1000x32xf32, #tpu.memory_space<vmem>>, vector<1x32xf32>
    %c15 = arith.constant 15 : index
    %c0_77 = arith.constant 0 : index
    %143 = vector.load %arg3[%c15, %c0_77] : memref<16x32xf32, #tpu.memory_space<vmem>>, vector<1x32xf32>
    tpu.vector_store %arg3[%c15, %c0_77], %142 {strides = array<i32>} : memref<16x32xf32, #tpu.memory_space<vmem>>, vector<1x32xf32>,
    return
  }
  func.func @transform_0(%arg0: i32, %arg1: memref<16xi32, #tpu.memory_space<smem>>) -> (i32, i32) {
    %c0_i32 = arith.constant 0 : i32
    %c0_i32_0 = arith.constant 0 : i32
    %c0_i32_1 = arith.constant 0 : i32
    return %c0_i32, %c0_i32_0 : i32, i32
  }
  func.func @transform_1(%arg0: i32, %arg1: memref<16xi32, #tpu.memory_space<smem>>) -> (i32, i32) {
    %c0_i32 = arith.constant 0 : i32
    %c0_i32_0 = arith.constant 0 : i32
    return %arg0, %c0_i32 : i32, i32
  }
}

</mosaic_0001>

<bundles_post_ra>
// kernel: tpu_custom_call.1
= control target key start
LH: loop header
LB: loop body
LE: loop exit
PB: predicated region body
PF: predicated region fallthrough
CT: control target
= control target key end

     0   :  { %s510_s0 = inlined_call_operand.vmem [shape: s32[16], index: 0, kind: input, shape index: {}]   ;;  %s511_s1 = inlined_call_operand.vmem [shape: f32[1000,32], index: 1, kind: input, shape index: {}]   ;;  %s512_s2 = inlined_call_operand.hbm [shape: f32[16,32], index: 2, kind: output, shape index: {}]  }
   0x1   :  { %s7_s11 = sshll.u32 %s510_s0, 4  ;;  %s8_s11 = int_to_ptr.vmem [resolvable:$true] %s7_s11 }
   0x2   :  { %s324_s12 = scalar_lea.vmem %s8_s11, 16  ;;  %p329_p1 = scmp.lt.s32.totalorder %s8_s11, %s8_s11 }
   0x3   :  { %p325_p0 = scmp.ne.s32.totalorder %s8_s11, %s324_s12  ;;  %p330_p2 = scmp.lt.s32.totalorder %s324_s12, %s324_s12 }
   0x5   :  { %p331_p3 = por %p330_p2, %p329_p1 }
   0x7   :  { %p332_p4 = pnand %p331_p3, %p325_p0 }
   0x9   :  { %335 = shalt.err (!%p332_p4)  }
   0xa   :  { %s362_s13 = smov [#allocation3]  }
   0xb   :  { %10 = dma.vmem_to_smem %s8_s11, 16, %s362_s13, [#allocation2] }
   0xc   :  { %358 = dma.done.wait [#allocation2], 16 }
   0xd   :  { %359 = vsyncadd [#allocation2], 4294967280 }
   0xe   :  { %12 = sfence }
   0xf   :  { %s17_s14 = sld [smem:[#allocation3]]  ;;  %s198_s15 = sld [smem:[#allocation3 + $0x1]] }
  0x10   :  { %s384_s16 = sld [smem:[#allocation3 + $0x2]]  ;;  %s386_s17 = sld [smem:[#allocation3 + $0x3]] }
  0x11   :  { %13 = vsyncpa [#allocation5], 0  ;;  %s388_s0 = sld [smem:[#allocation3 + $0x4]]  ;;  %s390_s18 = sld [smem:[#allocation3 + $0x5]]  ;;  %vm24_vm0 = vcmask 253952  }
  0x12   :  { %s392_s19 = sld [smem:[#allocation3 + $0x6]]  ;;  %s394_s20 = sld [smem:[#allocation3 + $0x7]] }
  0x13   :  { %s396_s21 = sld [smem:[#allocation3 + $0x8]]  ;;  %s398_s22 = sld [smem:[#allocation3 + $0x9]] }
  0x14   :  { %s400_s23 = sld [smem:[#allocation3 + $0xa]]  ;;  %s402_s24 = sld [smem:[#allocation3 + $0xb]] }
  0x15   :  { %p18_p5 = scmp.gt.s32.totalorder %s17_s14, 0  ;;  %p193_p6 = scmp.lt.s32.totalorder %s17_s14, 999 }
  0x16   :  { %p28_p7 = scmp.gt.s32.totalorder %s198_s15, 0  ;;  %p199_p8 = scmp.lt.s32.totalorder %s198_s15, 999 }
  0x17   :  { %s514_s14 = smov (!%p18_p5, %s17_s14), 0  ;;  %p37_p9 = scmp.gt.s32.totalorder %s384_s16, 0 }
  0x18   :  { %s516_s15 = smov (!%p28_p7, %s198_s15), 0  ;;  %s518_s14 = smov (!%p193_p6, %s514_s14), 999 }
  0x19   :  { %s520_s15 = smov (!%p199_p8, %s516_s15), 999  ;;  %s22_s27 = scalar_lea.vmem %s511_s1, %s518_s14 }
  0x1a   :  { %v23_v0 = vld [vmem:[%s22_s27] sm:$0x1]  ;;  %s32_s30 = scalar_lea.vmem %s511_s1, %s520_s15  ;;  %p205_p10 = scmp.lt.s32.totalorder %s384_s16, 999 }
  0x1b   :  { %25 = vst.msk [vmem:[#allocation4] sm:$0x1] %vm24_vm0, %v23_v0  ;;  %v33_v1 = vld [vmem:[%s32_s30] sm:$0x1]  ;;  %s522_s16 = smov (!%p37_p9, %s384_s16), 0  ;;  %p46_p11 = scmp.gt.s32.totalorder %s386_s17, 0 }
  0x1c   :  { %34 = vst.msk [vmem:[#allocation4 + $0x1] sm:$0x1] %vm24_vm0, %v33_v1  ;;  %p211_p12 = scmp.lt.s32.totalorder %s386_s17, 999  ;;  %s524_s16 = smov (!%p205_p10, %s522_s16), 999 }
  0x1d   :  { %s526_s17 = smov (!%p46_p11, %s386_s17), 0  ;;  %s41_s5 = scalar_lea.vmem %s511_s1, %s524_s16 }
  0x1e   :  { %p55_p13 = scmp.gt.s32.totalorder %s388_s0, 0  ;;  %v42_v2 = vld [vmem:[%s41_s5] sm:$0x1]  ;;  %s528_s17 = smov (!%p211_p12, %s526_s17), 999 }
  0x1f   :  { %43 = vst.msk [vmem:[#allocation4 + $0x2] sm:$0x1] %vm24_vm0, %v42_v2  ;;  %s50_s9 = scalar_lea.vmem %s511_s1, %s528_s17  ;;  %p217_p0 = scmp.lt.s32.totalorder %s388_s0, 999 }
  0x20   :  { %s56_s6 = scalar_select %p55_p13, %s388_s0, 0  ;;  %v51_v3 = vld [vmem:[%s50_s9] sm:$0x1] }
  0x21   :  { %p64_p1 = scmp.gt.s32.totalorder %s390_s18, 0  ;;  %p223_p2 = scmp.lt.s32.totalorder %s390_s18, 999  ;;  %52 = vst.msk [vmem:[#allocation4 + $0x3] sm:$0x1] %vm24_vm0, %v51_v3 }
  0x22   :  { %s530_s6 = smov (!%p217_p0, %s56_s6), 999  ;;  %p73_p3 = scmp.gt.s32.totalorder %s392_s19, 0 }
  0x23   :  { %s532_s18 = smov (!%p64_p1, %s390_s18), 0  ;;  %s59_s12 = scalar_lea.vmem %s511_s1, %s530_s6 }
  0x24   :  { %v60_v4 = vld [vmem:[%s59_s12] sm:$0x1]  ;;  %s534_s18 = smov (!%p223_p2, %s532_s18), 999  ;;  %p229_p4 = scmp.lt.s32.totalorder %s392_s19, 999 }
  0x25   :  { %61 = vst.msk [vmem:[#allocation4 + $0x4] sm:$0x1] %vm24_vm0, %v60_v4  ;;  %s74_s13 = scalar_select %p73_p3, %s392_s19, 0 }
  0x26   :  { %s68_s16 = scalar_lea.vmem %s511_s1, %s534_s18  ;;  %p82_p5 = scmp.gt.s32.totalorder %s394_s20, 0 }
  0x27   :  { %v69_v5 = vld [vmem:[%s68_s16] sm:$0x1]  ;;  %p235_p6 = scmp.lt.s32.totalorder %s394_s20, 999  ;;  %s536_s13 = smov (!%p229_p4, %s74_s13), 999 }
  0x28   :  { %70 = vst.msk [vmem:[#allocation4 + $0x5] sm:$0x1] %vm24_vm0, %v69_v5  ;;  %s538_s20 = smov (!%p82_p5, %s394_s20), 0  ;;  %s77_s25 = scalar_lea.vmem %s511_s1, %s536_s13 }
  0x29   :  { %p91_p7 = scmp.gt.s32.totalorder %s396_s21, 0  ;;  %v78_v6 = vld [vmem:[%s77_s25] sm:$0x1]  ;;  %s540_s20 = smov (!%p235_p6, %s538_s20), 999 }
  0x2a   :  { %79 = vst.msk [vmem:[#allocation4 + $0x6] sm:$0x1] %vm24_vm0, %v78_v6  ;;  %s86_s27 = scalar_lea.vmem %s511_s1, %s540_s20  ;;  %p241_p8 = scmp.lt.s32.totalorder %s396_s21, 999 }
  0x2b   :  { %s92_s18 = scalar_select %p91_p7, %s396_s21, 0  ;;  %v87_v7 = vld [vmem:[%s86_s27] sm:$0x1] }
  0x2c   :  { %p100_p9 = scmp.gt.s32.totalorder %s398_s22, 0  ;;  %p247_p10 = scmp.lt.s32.totalorder %s398_s22, 999  ;;  %88 = vst.msk [vmem:[#allocation4 + $0x7] sm:$0x1] %vm24_vm0, %v87_v7 }
  0x2d   :  { %s542_s18 = smov (!%p241_p8, %s92_s18), 999  ;;  %p109_p11 = scmp.gt.s32.totalorder %s400_s23, 0 }
  0x2e   :  { %s544_s22 = smov (!%p100_p9, %s398_s22), 0  ;;  %s95_s30 = scalar_lea.vmem %s511_s1, %s542_s18 }
  0x2f   :  { %v96_v8 = vld [vmem:[%s95_s30] sm:$0x1]  ;;  %s546_s22 = smov (!%p247_p10, %s544_s22), 999  ;;  %p253_p12 = scmp.lt.s32.totalorder %s400_s23, 999 }
  0x30   :  { %97 = vst.msk [vmem:[#allocation4 + $0x8] sm:$0x1] %vm24_vm0, %v96_v8  ;;  %s110_s20 = scalar_select %p109_p11, %s400_s23, 0 }
  0x31   :  { %s104_s4 = scalar_lea.vmem %s511_s1, %s546_s22  ;;  %p118_p13 = scmp.gt.s32.totalorder %s402_s24, 0 }
  0x32   :  { %v105_v9 = vld [vmem:[%s104_s4] sm:$0x1]  ;;  %p259_p0 = scmp.lt.s32.totalorder %s402_s24, 999  ;;  %s548_s20 = smov (!%p253_p12, %s110_s20), 999 }
  0x33   :  { %106 = vst.msk [vmem:[#allocation4 + $0x9] sm:$0x1] %vm24_vm0, %v105_v9  ;;  %s550_s24 = smov (!%p118_p13, %s402_s24), 0  ;;  %s113_s7 = scalar_lea.vmem %s511_s1, %s548_s20 }
  0x34   :  { %s264_s8 = sld [smem:[#allocation3 + $0xc]]  ;;  %v114_v10 = vld [vmem:[%s113_s7] sm:$0x1]  ;;  %s552_s24 = smov (!%p259_p0, %s550_s24), 999 }
  0x35   :  { %115 = vst.msk [vmem:[#allocation4 + $0xa] sm:$0x1] %vm24_vm0, %v114_v10  ;;  %s270_s9 = sld [smem:[#allocation3 + $0xd]]  ;;  %s122_s23 = scalar_lea.vmem %s511_s1, %s552_s24 }
  0x36   :  { %v123_v11 = vld [vmem:[%s122_s23] sm:$0x1]  ;;  %s276_s11 = sld [smem:[#allocation3 + $0xe]]  ;;  %s282_s12 = sld [smem:[#allocation3 + $0xf]] }
  0x37   :  { %124 = vst.msk [vmem:[#allocation4 + $0xb] sm:$0x1] %vm24_vm0, %v123_v11  ;;  %s363_s26 = smov [#allocation4]  }
  0x38   :  { %s166_s27 = sshll.u32 %s363_s26, 4  ;;  %s167_s27 = int_to_ptr.vmem [resolvable:$true] %s166_s27 }
  0x39   :  { %s336_s20 = scalar_lea.vmem %s167_s27, 256  ;;  %p341_p10 = scmp.lt.s32.totalorder %s167_s27, %s167_s27 }
  0x3a   :  { %p127_p1 = scmp.gt.s32.totalorder %s264_s8, 0  ;;  %p265_p2 = scmp.lt.s32.totalorder %s264_s8, 999 }
  0x3b   :  { %p136_p3 = scmp.gt.s32.totalorder %s270_s9, 0  ;;  %p271_p4 = scmp.lt.s32.totalorder %s270_s9, 999 }
  0x3c   :  { %s554_s8 = smov (!%p127_p1, %s264_s8), 0  ;;  %p145_p5 = scmp.gt.s32.totalorder %s276_s11, 0 }
  0x3d   :  { %s556_s8 = smov (!%p265_p2, %s554_s8), 999  ;;  %s558_s9 = smov (!%p136_p3, %s270_s9), 0 }
  0x3e   :  { %s131_s15 = scalar_lea.vmem %s511_s1, %s556_s8  ;;  %s560_s9 = smov (!%p271_p4, %s558_s9), 999 }
  0x3f   :  { %v132_v12 = vld [vmem:[%s131_s15] sm:$0x1]  ;;  %s146_s24 = scalar_select %p145_p5, %s276_s11, 0 }
  0x40   :  { %133 = vst.msk [vmem:[#allocation4 + $0xc] sm:$0x1] %vm24_vm0, %v132_v12  ;;  %s140_s0 = scalar_lea.vmem %s511_s1, %s560_s9  ;;  %p277_p6 = scmp.lt.s32.totalorder %s276_s11, 999 }
  0x41   :  { %v141_v13 = vld [vmem:[%s140_s0] sm:$0x1]  ;;  %p154_p7 = scmp.gt.s32.totalorder %s282_s12, 0  ;;  %p283_p8 = scmp.lt.s32.totalorder %s282_s12, 999 }
  0x42   :  { %142 = vst.msk [vmem:[#allocation4 + $0xd] sm:$0x1] %vm24_vm0, %v141_v13  ;;  %s562_s24 = smov (!%p277_p6, %s146_s24), 999  ;;  %p337_p9 = scmp.ne.s32.totalorder %s167_s27, %s336_s20 }
  0x43   :  { %s564_s12 = smov (!%p154_p7, %s282_s12), 0  ;;  %s149_s19 = scalar_lea.vmem %s511_s1, %s562_s24 }
  0x44   :  { %v150_v14 = vld [vmem:[%s149_s19] sm:$0x1]  ;;  %s566_s12 = smov (!%p283_p8, %s564_s12), 999  ;;  %p342_p11 = scmp.lt.s32.totalorder %s336_s20, %s336_s20 }
  0x45   :  { %151 = vst.msk [vmem:[#allocation4 + $0xe] sm:$0x1] %vm24_vm0, %v150_v14  ;;  %s158_s30 = scalar_lea.vmem %s511_s1, %s566_s12 }
  0x46   :  { %v159_v15 = vld [vmem:[%s158_s30] sm:$0x1]  ;;  %p343_p12 = por %p342_p11, %p341_p10 }
  0x47   :  { %160 = vst.msk [vmem:[#allocation4 + $0xf] sm:$0x1] %vm24_vm0, %v159_v15 }
  0x48   :  { %p344_p13 = pnand %p343_p12, %p337_p9 }
  0x4a   :  { %347 = shalt.err (!%p344_p13)
}
  0x4b   :  { %s348_s4 = scalar_lea.hbm %s512_s2, 256 }
  0x4c   :  { %p349_p0 = scmp.ne.s32.totalorder %s512_s2, %s348_s4  ;;  %p352_p1 = scmp.lt.u32.totalorder %s348_s4, %s512_s2 }
  0x4e   :  { %p354_p2 = pnand %p352_p1, %p349_p0 }
  0x50   :  { %357 = shalt.err (!%p354_p2)
}
  0x51   :  { %s364_s8 = smov 128   ;;  %s365_s9 = smov 8  }
  0x52   :  { %172 = dma.vmem_to_hbm [thread:$0]  %s167_s27, 256, %s512_s2, [#allocation5], %s364_s8, %s364_s8, %s365_s9  }
  0x53   :  { %360 = dma.done.wait [#allocation5], 256  }
  0x54   :  { %361 = vsyncadd [#allocation5], 4294967040 }
  0x55   :  { %176 = vsyncpa [#allocation5], 1 }

</bundles_post_ra>
